<compile_context>
chip_gen: v7x
topology: tpu7x:2x2x1
jax: 0.10.0
libtpu: 0.0.40
codegen_flags: <defaults>
</compile_context>

<pallas_src>
import functools

import jax
import jax.numpy as jnp
from jax.experimental import pallas as pl
from jax.experimental.pallas import tpu as pltpu

IGNORE_INDEX = -100
SYM_KD_RATIO = 0.5

_V_CHUNK_MAX = 2048     # lane-chunk of the vocab axis (multiple of 128)
_ROW_TILE_MAX = 2048    # upper bound on rows per grid step


def _cdiv(a, b):
    return -(-a // b)


def _round_up(a, b):
    return _cdiv(a, b) * b


def _vmem_capacity_bytes():
    """Per-TensorCore VMEM capacity; conservative fallback = v7x (64 MiB)."""
    try:
        return int(pltpu.get_tpu_info().vmem_capacity_bytes)
    except Exception:
        return 64 * 1024 * 1024


def _choose_tiles(n_rows, vocab, itemsize_sum, vmem_budget):
    """Pick (row_tile, v_chunk) so one grid step fits the VMEM budget."""
    if vocab <= _V_CHUNK_MAX:
        v_chunk = vocab                 # single chunk; full-dim block is always legal
    else:
        v_chunk = _V_CHUNK_MAX          # multiple of 128; ragged tail masked in-kernel

    # Per-row byte model for one grid step (heuristic — verify with
    # pl.lower_as_mlir / the compile report if it is ever tight):
    #   2 logits inputs x 2 pipeline buffers x v_chunk x itemsize
    #   ~6 full-width f32 temporaries (casts / exp / where results)
    #   8 per-row f32 stats + labels block, each lane-padded to 128
    bytes_per_row = v_chunk * (2 * itemsize_sum + 6 * 4) + 10 * 128 * 4
    row_tile = vmem_budget // max(bytes_per_row, 1)

    # v7x megacore + pipelining: aim for >= ~4 row tiles when N allows it.
    row_tile = min(row_tile, max(8, _round_up(_cdiv(n_rows, 4), 8)))
    row_tile = min(row_tile, _round_up(n_rows, 8), _ROW_TILE_MAX)
    # Sublane-aligned; the >=8 floor is safe now that the vocab is chunked
    # (8 rows x v_chunk is far below any generation's VMEM).
    row_tile = max(8, (row_tile // 8) * 8)
    return int(row_tile), int(v_chunk)


def _sym_kl_kernel(student_ref, teacher_ref, labels_ref, out_ref,
                   m_s_ref, m_t_ref, ssum_ref, tsum_ref,
                   a1_ref, a2_ref, b1_ref, b2_ref,
                   *, vocab, v_chunk, ignore_index, assume_finite):
    vi = pl.program_id(1)
    nv = pl.num_programs(1)

    s = student_ref[...].astype(jnp.float32)      # (T, Vc)
    t = teacher_ref[...].astype(jnp.float32)      # (T, Vc)

    # Mask out-of-range lanes of a partial last vocab chunk (static no-op when
    # v_chunk divides vocab).  -inf fill is absorbed by the isinf masks; the
    # finite fill keeps the assume_finite path NaN-free.
    if vocab % v_chunk != 0:
        col = vi * v_chunk + jax.lax.broadcasted_iota(jnp.int32, s.shape, 1)
        lane_ok = col < vocab
        fill = -1e30 if assume_finite else -jnp.inf
        s = jnp.where(lane_ok, s, fill)
        t = jnp.where(lane_ok, t, fill)

    @pl.when(vi == 0)
    def _():
        # Finite "-inf" init keeps the online-rescaling deltas finite.
        m_s_ref[...] = jnp.full_like(m_s_ref, -1e30)
        m_t_ref[...] = jnp.full_like(m_t_ref, -1e30)
        ssum_ref[...] = jnp.zeros_like(ssum_ref)
        tsum_ref[...] = jnp.zeros_like(tsum_ref)
        a1_ref[...] = jnp.zeros_like(a1_ref)
        a2_ref[...] = jnp.zeros_like(a2_ref)
        b1_ref[...] = jnp.zeros_like(b1_ref)
        b2_ref[...] = jnp.zeros_like(b2_ref)

    # ---- online (flash-softmax style) update over vocab chunks ----
    m_s_old = m_s_ref[...]
    m_t_old = m_t_ref[...]
    m_s_new = jnp.maximum(m_s_old, jnp.max(s, axis=-1, keepdims=True))
    m_t_new = jnp.maximum(m_t_old, jnp.max(t, axis=-1, keepdims=True))
    # Clamp so exp() underflows to ~0 instead of producing -inf*0 = NaN.
    d_s = jnp.maximum(m_s_old - m_s_new, -100.0)
    d_t = jnp.maximum(m_t_old - m_t_new, -100.0)
    alpha = jnp.exp(d_s)          # rescale for student-exp accumulators
    beta = jnp.exp(d_t)           # rescale for teacher-exp accumulators

    s_sh = s - m_s_new
    t_sh = t - m_t_new
    s_e = jnp.exp(s_sh)
    t_e = jnp.exp(t_sh)

    c_s_sum = jnp.sum(s_e, axis=-1, keepdims=True)       # (T, 1)
    c_t_sum = jnp.sum(t_e, axis=-1, keepdims=True)

    if assume_finite:
        # No isinf masks; the per-row mask-weighted exp sums collapse onto S, T.
        c_a1 = jnp.sum(t_e * s_sh, axis=-1, keepdims=True)
        c_b1 = jnp.sum(s_e * (t_sh - s_sh), axis=-1, keepdims=True)
        a1_ref[...] = beta * (a1_ref[...] + d_s * tsum_ref[...]) + c_a1
        b1_ref[...] = alpha * (b1_ref[...] + (d_t - d_s) * ssum_ref[...]) + c_b1
    else:
        s_inf = jnp.isinf(s)
        both_inf = jnp.logical_or(s_inf, jnp.isinf(t))
        c_a1 = jnp.sum(jnp.where(s_inf, 0.0, t_e * s_sh), axis=-1, keepdims=True)
        c_a2 = jnp.sum(jnp.where(s_inf, 0.0, t_e), axis=-1, keepdims=True)
        c_b1 = jnp.sum(jnp.where(both_inf, 0.0, s_e * (t_sh - s_sh)),
                       axis=-1, keepdims=True)
        c_b2 = jnp.sum(jnp.where(both_inf, 0.0, s_e), axis=-1, keepdims=True)
        # Use the OLD a2/b2 in the a1/b1 corrections, then update a2/b2.
        a1_ref[...] = beta * (a1_ref[...] + d_s * a2_ref[...]) + c_a1
        a2_ref[...] = beta * a2_ref[...] + c_a2
        b1_ref[...] = alpha * (b1_ref[...] + (d_t - d_s) * b2_ref[...]) + c_b1
        b2_ref[...] = alpha * b2_ref[...] + c_b2

    ssum_ref[...] = alpha * ssum_ref[...] + c_s_sum
    tsum_ref[...] = beta * tsum_ref[...] + c_t_sum
    m_s_ref[...] = m_s_new
    m_t_ref[...] = m_t_new

    # ---- finalize this row tile ----
    @pl.when(vi == nv - 1)
    def _():
        S = ssum_ref[...]
        T = tsum_ref[...]
        logS = jnp.log(S)
        logT = jnp.log(T)
        if assume_finite:
            x_fkl = a1_ref[...] / T - logS
            x_rkl = b1_ref[...] / S + (logS - logT)
        else:
            x_fkl = (a1_ref[...] - logS * a2_ref[...]) / T
            x_rkl = (b1_ref[...] + (logS - logT) * b2_ref[...]) / S

        # TODO(synk): labels stay a narrow (T, 1) VMEM block; a scalar-prefetch
        # SMEM path would shave one tiny DMA per row tile (low priority).
        valid = labels_ref[...] != ignore_index            # (T, 1) bool
        maskf = valid.astype(jnp.float32)
        # jnp.where (not multiply) so NaN/Inf from garbage tail rows cannot leak.
        fkl_p = jnp.sum(jnp.where(valid, x_fkl, 0.0), axis=0, keepdims=True)  # (1,1)
        rkl_p = jnp.sum(jnp.where(valid, x_rkl, 0.0), axis=0, keepdims=True)
        cnt_p = jnp.sum(maskf, axis=0, keepdims=True)

        # Lane-dense (8, 128) partial block: [fkl, rkl, count] at sublane 0.
        lane = jax.lax.broadcasted_iota(jnp.int32, (8, 128), 1)
        sub = jax.lax.broadcasted_iota(jnp.int32, (8, 128), 0)
        first = sub == 0
        out_ref[...] = jnp.where(first & (lane == 0), fkl_p,
                        jnp.where(first & (lane == 1), rkl_p,
                        jnp.where(first & (lane == 2), cnt_p, 0.0)))


def symmetric_kl_loss(student_logits, teacher_logits, labels,
                      normalize=True,
                      sym_kd_ratio=SYM_KD_RATIO,
                      ignore_index=IGNORE_INDEX,
                      assume_finite=False,
                      row_tile=None,
                      v_chunk=None):
    """student/teacher: (N, V) float (f32 or bf16); labels: (N,) int. Scalar f32 loss."""
    N, V = student_logits.shape
    labels = labels.reshape(-1).astype(jnp.int32)

    cap = _vmem_capacity_bytes()
    vmem_budget = int(cap * 0.60)
    vmem_limit = int(cap * 0.85)

    itemsize_sum = student_logits.dtype.itemsize + teacher_logits.dtype.itemsize
    auto_rt, auto_vc = _choose_tiles(N, V, itemsize_sum, vmem_budget)
    if row_tile is None:
        row_tile = auto_rt
    if v_chunk is None:
        v_chunk = auto_vc

    num_row_tiles = _cdiv(N, row_tile)
    num_v_chunks = _cdiv(V, v_chunk)
    Np = num_row_tiles * row_tile
    # Pad ONLY the tiny labels array with ignore_index (covers ragged row tail);
    # logits stay unpadded so there is no extra HBM pass.
    if Np != N:
        labels = jnp.pad(labels, (0, Np - N), constant_values=ignore_index)
    labels2d = labels.reshape(Np, 1)

    kernel = functools.partial(
        _sym_kl_kernel, vocab=V, v_chunk=v_chunk,
        ignore_index=ignore_index, assume_finite=assume_finite)

    cost = pl.CostEstimate(
        flops=int(14 * N * V),
        transcendentals=int(2 * N * V),
        bytes_accessed=int(N * V * itemsize_sum + Np * 4
                           + num_row_tiles * 8 * 128 * 4),
    )

    partials = pl.pallas_call(
        kernel,
        out_shape=jax.ShapeDtypeStruct((num_row_tiles * 8, 128), jnp.float32),
        grid_spec=pltpu.PrefetchScalarGridSpec(
            num_scalar_prefetch=0,
            grid=(num_row_tiles, num_v_chunks),
            in_specs=[
                pl.BlockSpec((row_tile, v_chunk), lambda i, vi: (i, vi)),
                pl.BlockSpec((row_tile, v_chunk), lambda i, vi: (i, vi)),
                pl.BlockSpec((row_tile, 1), lambda i, vi: (i, 0)),
            ],
            out_specs=pl.BlockSpec((8, 128), lambda i, vi: (i, 0)),
            scratch_shapes=[pltpu.VMEM((row_tile, 1), jnp.float32)] * 8,
        ),
        compiler_params=pltpu.CompilerParams(
            dimension_semantics=("parallel", "arbitrary"),
            vmem_limit_bytes=vmem_limit),
        cost_estimate=cost,
    )(student_logits, teacher_logits, labels2d)

    col = jnp.sum(partials, axis=0)           # (128,) — unused lanes are zero
    sum_fkl, sum_rkl, sum_mask = col[0], col[1], col[2]

    if normalize:
        fkl = jnp.where(sum_mask == 0, 0.0, -sum_fkl / sum_mask)
        rkl = jnp.where(sum_mask == 0, 0.0, -sum_rkl / sum_mask)
    else:
        fkl = -sum_fkl
        rkl = -sum_rkl

    return sym_kd_ratio * fkl + (1.0 - sym_kd_ratio) * rkl


def _reference(student, teacher, labels, normalize=True,
               sym_kd_ratio=SYM_KD_RATIO, ignore_index=IGNORE_INDEX):
    """Pure-JAX reference mirroring the PyTorch SymmetricKLLoss."""
    s = student.astype(jnp.float32)
    t = teacher.astype(jnp.float32)
    t_prob = jax.nn.softmax(t, axis=-1)
    s_logprob = jax.nn.log_softmax(s, axis=-1)
    s_prob = jax.nn.softmax(s, axis=-1)
    t_logprob = jax.nn.log_softmax(t, axis=-1)
    s_inf = jnp.isinf(s)
    both_inf = s_inf | jnp.isinf(t)
    x_f = jnp.sum(jnp.where(s_inf, 0.0, t_prob * s_logprob), axis=-1)
    x_r = jnp.sum(jnp.where(both_inf, 0.0, s_prob * t_logprob)
                  - jnp.where(both_inf, 0.0, s_prob * s_logprob), axis=-1)
    mask = (labels.reshape(-1) != ignore_index).astype(jnp.float32)
    sm = jnp.sum(mask)
    if normalize:
        fkl = jnp.where(sm == 0, 0.0, -jnp.sum(x_f * mask) / sm)
        rkl = jnp.where(sm == 0, 0.0, -jnp.sum(x_r * mask) / sm)
    else:
        fkl = -jnp.sum(x_f * mask)
        rkl = -jnp.sum(x_r * mask)
    return sym_kd_ratio * fkl + (1.0 - sym_kd_ratio) * rkl


if __name__ == "__main__":
    key = jax.random.PRNGKey(0)
    k1, k2, k3, k4, k5 = jax.random.split(key, 5)

    # --- config 1: small, single vocab chunk, f32 ---
    batch, num_tokens, vocab = 2, 8, 128
    N = batch * num_tokens
    student = jax.random.normal(k1, (N, vocab), dtype=jnp.float32)
    teacher = jax.random.normal(k2, (N, vocab), dtype=jnp.float32)
    labels = jax.random.randint(k3, (N,), 0, vocab, dtype=jnp.int32)
    labels = labels.at[::5].set(IGNORE_INDEX)   # some ignored targets

    loss = jax.block_until_ready(symmetric_kl_loss(student, teacher, labels,
                                                   normalize=True))
    ref = _reference(student, teacher, labels, normalize=True)
    assert jnp.allclose(loss, ref, rtol=1e-4, atol=1e-4), (loss, ref)

    loss_nn = jax.block_until_ready(symmetric_kl_loss(student, teacher, labels,
                                                      normalize=False))
    ref_nn = _reference(student, teacher, labels, normalize=False)
    assert jnp.allclose(loss_nn, ref_nn, rtol=1e-4, atol=1e-3), (loss_nn, ref_nn)

    # assume_finite fast path (same inputs, no -inf)
    loss_ff = jax.block_until_ready(symmetric_kl_loss(student, teacher, labels,
                                                      normalize=True,
                                                      assume_finite=True))
    assert jnp.allclose(loss_ff, ref, rtol=1e-4, atol=1e-4), (loss_ff, ref)

    # --- config 2: chunked vocab + ragged vocab & row tails + -inf masked logits ---
    N2, V2 = 21, 320
    s2 = jax.random.normal(k4, (N2, V2), dtype=jnp.float32)
    t2 = jax.random.normal(k5, (N2, V2), dtype=jnp.float32)
    s2 = s2.at[:, 5].set(-jnp.inf)    # vocab masking in the student
    t2 = t2.at[:, 7].set(-jnp.inf)    # vocab masking in the teacher
    l2 = jax.random.randint(k3, (N2,), 0, V2, dtype=jnp.int32)
    l2 = l2.at[::3].set(IGNORE_INDEX)
    loss2 = jax.block_until_ready(symmetric_kl_loss(s2, t2, l2, normalize=True,
                                                    v_chunk=128))
    ref2 = _reference(s2, t2, l2, normalize=True)
    assert jnp.allclose(loss2, ref2, rtol=1e-4, atol=1e-4), (loss2, ref2)

    # --- config 3: bf16 logits (halves HBM bytes on the mem-bound v5e/v6e path) ---
    loss3 = jax.block_until_ready(symmetric_kl_loss(
        student.astype(jnp.bfloat16), teacher.astype(jnp.bfloat16), labels,
        normalize=True))
    ref3 = _reference(student.astype(jnp.bfloat16), teacher.astype(jnp.bfloat16),
                      labels, normalize=True)
    assert jnp.allclose(loss3, ref3, rtol=1e-4, atol=1e-4), (loss3, ref3)

    print("KERNEL_OK")
</pallas_src>

<mosaic_0001>
module attributes {stable_mosaic.version = 11 : i64} {
  func.func @_sym_kl_kernel(%arg0: i32, %arg1: i32, %arg2: memref<8x128xf32, #tpu.memory_space<vmem>>, %arg3: memref<8x128xf32, #tpu.memory_space<vmem>>, %arg4: memref<8x1xi32, #tpu.memory_space<vmem>>, %arg5: memref<8x128xf32, #tpu.memory_space<vmem>>, %arg6: memref<8x1xf32, #tpu.memory_space<vmem>>, %arg7: memref<8x1xf32, #tpu.memory_space<vmem>>, %arg8: memref<8x1xf32, #tpu.memory_space<vmem>>, %arg9: memref<8x1xf32, #tpu.memory_space<vmem>>, %arg10: memref<8x1xf32, #tpu.memory_space<vmem>>, %arg11: memref<8x1xf32, #tpu.memory_space<vmem>>, %arg12: memref<8x1xf32, #tpu.memory_space<vmem>>, %arg13: memref<8x1xf32, #tpu.memory_space<vmem>>) attributes {dimension_semantics = [#tpu.dimension_semantics<parallel>, #tpu.dimension_semantics<arbitrary>], iteration_bounds = array<i64: 2, 1>, scalar_prefetch = 0 : i64, scratch_operands = 8 : i64, tpu.core_type = #tpu.core_type<tc>, window_params = [{transform_indices = @transform_0, window_bounds = array<i64: 8, 128>}, {transform_indices = @transform_1, window_bounds = array<i64: 8, 128>}, {transform_indices = @transform_2, window_bounds = array<i64: 8, 1>}, {transform_indices = @transform_3, window_bounds = array<i64: 8, 128>}]} {
    %c0 = arith.constant 0 : index
    %c0_0 = arith.constant 0 : index
    %0 = vector.load %arg2[%c0, %c0_0] : memref<8x128xf32, #tpu.memory_space<vmem>>, vector<8x128xf32>
    %c0_1 = arith.constant 0 : index
    %c0_2 = arith.constant 0 : index
    %1 = vector.load %arg3[%c0_1, %c0_2] : memref<8x128xf32, #tpu.memory_space<vmem>>, vector<8x128xf32>
    %c0_i32 = arith.constant 0 : i32
    %2 = arith.cmpi eq, %arg1, %c0_i32 : i32
    %3 = arith.extui %2 : i1 to i32
    %c0_i32_3 = arith.constant 0 : i32
    %4 = arith.cmpi ne, %3, %c0_i32_3 : i32
    scf.if %4 {
      %cst_57 = arith.constant -1.000000e+30 : f32
      %93 = vector.broadcast %cst_57 : f32 to vector<8x1xf32>
      %c0_58 = arith.constant 0 : index
      %c0_59 = arith.constant 0 : index
      %94 = vector.load %arg6[%c0_58, %c0_59] : memref<8x1xf32, #tpu.memory_space<vmem>>, vector<8x1xf32>
      tpu.vector_store %arg6[%c0_58, %c0_59], %93 {strides = array<i32>} : memref<8x1xf32, #tpu.memory_space<vmem>>, vector<8x1xf32>,
      %cst_60 = arith.constant -1.000000e+30 : f32
      %95 = vector.broadcast %cst_60 : f32 to vector<8x1xf32>
      %c0_61 = arith.constant 0 : index
      %c0_62 = arith.constant 0 : index
      %96 = vector.load %arg7[%c0_61, %c0_62] : memref<8x1xf32, #tpu.memory_space<vmem>>, vector<8x1xf32>
      tpu.vector_store %arg7[%c0_61, %c0_62], %95 {strides = array<i32>} : memref<8x1xf32, #tpu.memory_space<vmem>>, vector<8x1xf32>,
      %cst_63 = arith.constant 0.000000e+00 : f32
      %97 = vector.broadcast %cst_63 : f32 to vector<8x1xf32>
      %c0_64 = arith.constant 0 : index
      %c0_65 = arith.constant 0 : index
      %98 = vector.load %arg8[%c0_64, %c0_65] : memref<8x1xf32, #tpu.memory_space<vmem>>, vector<8x1xf32>
      tpu.vector_store %arg8[%c0_64, %c0_65], %97 {strides = array<i32>} : memref<8x1xf32, #tpu.memory_space<vmem>>, vector<8x1xf32>,
      %cst_66 = arith.constant 0.000000e+00 : f32
      %99 = vector.broadcast %cst_66 : f32 to vector<8x1xf32>
      %c0_67 = arith.constant 0 : index
      %c0_68 = arith.constant 0 : index
      %100 = vector.load %arg9[%c0_67, %c0_68] : memref<8x1xf32, #tpu.memory_space<vmem>>, vector<8x1xf32>
      tpu.vector_store %arg9[%c0_67, %c0_68], %99 {strides = array<i32>} : memref<8x1xf32, #tpu.memory_space<vmem>>, vector<8x1xf32>,
      %cst_69 = arith.constant 0.000000e+00 : f32
      %101 = vector.broadcast %cst_69 : f32 to vector<8x1xf32>
      %c0_70 = arith.constant 0 : index
      %c0_71 = arith.constant 0 : index
      %102 = vector.load %arg10[%c0_70, %c0_71] : memref<8x1xf32, #tpu.memory_space<vmem>>, vector<8x1xf32>
      tpu.vector_store %arg10[%c0_70, %c0_71], %101 {strides = array<i32>} : memref<8x1xf32, #tpu.memory_space<vmem>>, vector<8x1xf32>,
      %cst_72 = arith.constant 0.000000e+00 : f32
      %103 = vector.broadcast %cst_72 : f32 to vector<8x1xf32>
      %c0_73 = arith.constant 0 : index
      %c0_74 = arith.constant 0 : index
      %104 = vector.load %arg11[%c0_73, %c0_74] : memref<8x1xf32, #tpu.memory_space<vmem>>, vector<8x1xf32>
      tpu.vector_store %arg11[%c0_73, %c0_74], %103 {strides = array<i32>} : memref<8x1xf32, #tpu.memory_space<vmem>>, vector<8x1xf32>,
      %cst_75 = arith.constant 0.000000e+00 : f32
      %105 = vector.broadcast %cst_75 : f32 to vector<8x1xf32>
      %c0_76 = arith.constant 0 : index
      %c0_77 = arith.constant 0 : index
      %106 = vector.load %arg12[%c0_76, %c0_77] : memref<8x1xf32, #tpu.memory_space<vmem>>, vector<8x1xf32>
      tpu.vector_store %arg12[%c0_76, %c0_77], %105 {strides = array<i32>} : memref<8x1xf32, #tpu.memory_space<vmem>>, vector<8x1xf32>,
      %cst_78 = arith.constant 0.000000e+00 : f32
      %107 = vector.broadcast %cst_78 : f32 to vector<8x1xf32>
      %c0_79 = arith.constant 0 : index
      %c0_80 = arith.constant 0 : index
      %108 = vector.load %arg13[%c0_79, %c0_80] : memref<8x1xf32, #tpu.memory_space<vmem>>, vector<8x1xf32>
      tpu.vector_store %arg13[%c0_79, %c0_80], %107 {strides = array<i32>} : memref<8x1xf32, #tpu.memory_space<vmem>>, vector<8x1xf32>,
    } else {
    }
    %c0_4 = arith.constant 0 : index
    %c0_5 = arith.constant 0 : index
    %5 = vector.load %arg6[%c0_4, %c0_5] : memref<8x1xf32, #tpu.memory_space<vmem>>, vector<8x1xf32>
    %c0_6 = arith.constant 0 : index
    %c0_7 = arith.constant 0 : index
    %6 = vector.load %arg7[%c0_6, %c0_7] : memref<8x1xf32, #tpu.memory_space<vmem>>, vector<8x1xf32>
    %cst = arith.constant dense<0xFF800000> : vector<8xf32>
    %7 = vector.multi_reduction <maximumf>, %0, %cst [1] : vector<8x128xf32> to vector<8xf32>
    %8 = vector.shape_cast %7 : vector<8xf32> to vector<8x1xf32>
    %9 = arith.maximumf %5, %8 : vector<8x1xf32>
    %cst_8 = arith.constant dense<0xFF800000> : vector<8xf32>
    %10 = vector.multi_reduction <maximumf>, %1, %cst_8 [1] : vector<8x128xf32> to vector<8xf32>
    %11 = vector.shape_cast %10 : vector<8xf32> to vector<8x1xf32>
    %12 = arith.maximumf %6, %11 : vector<8x1xf32>
    %13 = arith.subf %5, %9 : vector<8x1xf32>
    %cst_9 = arith.constant -1.000000e+02 : f32
    %14 = vector.broadcast %cst_9 : f32 to vector<8x1xf32>
    %15 = arith.maximumf %13, %14 : vector<8x1xf32>
    %16 = arith.subf %6, %12 : vector<8x1xf32>
    %cst_10 = arith.constant -1.000000e+02 : f32
    %17 = vector.broadcast %cst_10 : f32 to vector<8x1xf32>
    %18 = arith.maximumf %16, %17 : vector<8x1xf32>
    %19 = math.exp %15 : vector<8x1xf32>
    %20 = math.exp %18 : vector<8x1xf32>
    %21 = vector.broadcast %9 : vector<8x1xf32> to vector<8x128xf32>
    %22 = arith.subf %0, %21 : vector<8x128xf32>
    %23 = vector.broadcast %12 : vector<8x1xf32> to vector<8x128xf32>
    %24 = arith.subf %1, %23 : vector<8x128xf32>
    %25 = math.exp %22 : vector<8x128xf32>
    %26 = math.exp %24 : vector<8x128xf32>
    %cst_11 = arith.constant dense<0.000000e+00> : vector<8xf32>
    %27 = vector.multi_reduction <add>, %25, %cst_11 [1] : vector<8x128xf32> to vector<8xf32>
    %28 = vector.shape_cast %27 : vector<8xf32> to vector<8x1xf32>
    %cst_12 = arith.constant dense<0.000000e+00> : vector<8xf32>
    %29 = vector.multi_reduction <add>, %26, %cst_12 [1] : vector<8x128xf32> to vector<8xf32>
    %30 = vector.shape_cast %29 : vector<8xf32> to vector<8x1xf32>
    %31 = math.absf %0 : vector<8x128xf32>
    %cst_13 = arith.constant 0x7F800000 : f32
    %32 = vector.broadcast %cst_13 : f32 to vector<8x128xf32>
    %33 = arith.cmpf oeq, %31, %32 : vector<8x128xf32>
    %34 = math.absf %1 : vector<8x128xf32>
    %cst_14 = arith.constant 0x7F800000 : f32
    %35 = vector.broadcast %cst_14 : f32 to vector<8x128xf32>
    %36 = arith.cmpf oeq, %34, %35 : vector<8x128xf32>
    %37 = arith.ori %33, %36 : vector<8x128xi1>
    %38 = arith.mulf %26, %22 : vector<8x128xf32>
    %cst_15 = arith.constant 0.000000e+00 : f32
    %39 = vector.broadcast %cst_15 : f32 to vector<8x128xf32>
    %40 = arith.select %33, %39, %38 : vector<8x128xi1>, vector<8x128xf32>
    %cst_16 = arith.constant dense<0.000000e+00> : vector<8xf32>
    %41 = vector.multi_reduction <add>, %40, %cst_16 [1] : vector<8x128xf32> to vector<8xf32>
    %42 = vector.shape_cast %41 : vector<8xf32> to vector<8x1xf32>
    %cst_17 = arith.constant 0.000000e+00 : f32
    %43 = vector.broadcast %cst_17 : f32 to vector<8x128xf32>
    %44 = arith.select %33, %43, %26 : vector<8x128xi1>, vector<8x128xf32>
    %cst_18 = arith.constant dense<0.000000e+00> : vector<8xf32>
    %45 = vector.multi_reduction <add>, %44, %cst_18 [1] : vector<8x128xf32> to vector<8xf32>
    %46 = vector.shape_cast %45 : vector<8xf32> to vector<8x1xf32>
    %47 = arith.subf %24, %22 : vector<8x128xf32>
    %48 = arith.mulf %25, %47 : vector<8x128xf32>
    %cst_19 = arith.constant 0.000000e+00 : f32
    %49 = vector.broadcast %cst_19 : f32 to vector<8x128xf32>
    %50 = arith.select %37, %49, %48 : vector<8x128xi1>, vector<8x128xf32>
    %cst_20 = arith.constant dense<0.000000e+00> : vector<8xf32>
    %51 = vector.multi_reduction <add>, %50, %cst_20 [1] : vector<8x128xf32> to vector<8xf32>
    %52 = vector.shape_cast %51 : vector<8xf32> to vector<8x1xf32>
    %cst_21 = arith.constant 0.000000e+00 : f32
    %53 = vector.broadcast %cst_21 : f32 to vector<8x128xf32>
    %54 = arith.select %37, %53, %25 : vector<8x128xi1>, vector<8x128xf32>
    %cst_22 = arith.constant dense<0.000000e+00> : vector<8xf32>
    %55 = vector.multi_reduction <add>, %54, %cst_22 [1] : vector<8x128xf32> to vector<8xf32>
    %56 = vector.shape_cast %55 : vector<8xf32> to vector<8x1xf32>
    %c0_23 = arith.constant 0 : index
    %c0_24 = arith.constant 0 : index
    %57 = vector.load %arg10[%c0_23, %c0_24] : memref<8x1xf32, #tpu.memory_space<vmem>>, vector<8x1xf32>
    %c0_25 = arith.constant 0 : index
    %c0_26 = arith.constant 0 : index
    %58 = vector.load %arg11[%c0_25, %c0_26] : memref<8x1xf32, #tpu.memory_space<vmem>>, vector<8x1xf32>
    %59 = arith.mulf %15, %58 : vector<8x1xf32>
    %60 = arith.addf %57, %59 : vector<8x1xf32>
    %61 = arith.mulf %20, %60 : vector<8x1xf32>
    %62 = arith.addf %61, %42 : vector<8x1xf32>
    %c0_27 = arith.constant 0 : index
    %c0_28 = arith.constant 0 : index
    %63 = vector.load %arg10[%c0_27, %c0_28] : memref<8x1xf32, #tpu.memory_space<vmem>>, vector<8x1xf32>
    tpu.vector_store %arg10[%c0_27, %c0_28], %62 {strides = array<i32>} : memref<8x1xf32, #tpu.memory_space<vmem>>, vector<8x1xf32>,
    %c0_29 = arith.constant 0 : index
    %c0_30 = arith.constant 0 : index
    %64 = vector.load %arg11[%c0_29, %c0_30] : memref<8x1xf32, #tpu.memory_space<vmem>>, vector<8x1xf32>
    %65 = arith.mulf %20, %64 : vector<8x1xf32>
    %66 = arith.addf %65, %46 : vector<8x1xf32>
    %c0_31 = arith.constant 0 : index
    %c0_32 = arith.constant 0 : index
    %67 = vector.load %arg11[%c0_31, %c0_32] : memref<8x1xf32, #tpu.memory_space<vmem>>, vector<8x1xf32>
    tpu.vector_store %arg11[%c0_31, %c0_32], %66 {strides = array<i32>} : memref<8x1xf32, #tpu.memory_space<vmem>>, vector<8x1xf32>,
    %c0_33 = arith.constant 0 : index
    %c0_34 = arith.constant 0 : index
    %68 = vector.load %arg12[%c0_33, %c0_34] : memref<8x1xf32, #tpu.memory_space<vmem>>, vector<8x1xf32>
    %69 = arith.subf %18, %15 : vector<8x1xf32>
    %c0_35 = arith.constant 0 : index
    %c0_36 = arith.constant 0 : index
    %70 = vector.load %arg13[%c0_35, %c0_36] : memref<8x1xf32, #tpu.memory_space<vmem>>, vector<8x1xf32>
    %71 = arith.mulf %69, %70 : vector<8x1xf32>
    %72 = arith.addf %68, %71 : vector<8x1xf32>
    %73 = arith.mulf %19, %72 : vector<8x1xf32>
    %74 = arith.addf %73, %52 : vector<8x1xf32>
    %c0_37 = arith.constant 0 : index
    %c0_38 = arith.constant 0 : index
    %75 = vector.load %arg12[%c0_37, %c0_38] : memref<8x1xf32, #tpu.memory_space<vmem>>, vector<8x1xf32>
    tpu.vector_store %arg12[%c0_37, %c0_38], %74 {strides = array<i32>} : memref<8x1xf32, #tpu.memory_space<vmem>>, vector<8x1xf32>,
    %c0_39 = arith.constant 0 : index
    %c0_40 = arith.constant 0 : index
    %76 = vector.load %arg13[%c0_39, %c0_40] : memref<8x1xf32, #tpu.memory_space<vmem>>, vector<8x1xf32>
    %77 = arith.mulf %19, %76 : vector<8x1xf32>
    %78 = arith.addf %77, %56 : vector<8x1xf32>
    %c0_41 = arith.constant 0 : index
    %c0_42 = arith.constant 0 : index
    %79 = vector.load %arg13[%c0_41, %c0_42] : memref<8x1xf32, #tpu.memory_space<vmem>>, vector<8x1xf32>
    tpu.vector_store %arg13[%c0_41, %c0_42], %78 {strides = array<i32>} : memref<8x1xf32, #tpu.memory_space<vmem>>, vector<8x1xf32>,
    %c0_43 = arith.constant 0 : index
    %c0_44 = arith.constant 0 : index
    %80 = vector.load %arg8[%c0_43, %c0_44] : memref<8x1xf32, #tpu.memory_space<vmem>>, vector<8x1xf32>
    %81 = arith.mulf %19, %80 : vector<8x1xf32>
    %82 = arith.addf %81, %28 : vector<8x1xf32>
    %c0_45 = arith.constant 0 : index
    %c0_46 = arith.constant 0 : index
    %83 = vector.load %arg8[%c0_45, %c0_46] : memref<8x1xf32, #tpu.memory_space<vmem>>, vector<8x1xf32>
    tpu.vector_store %arg8[%c0_45, %c0_46], %82 {strides = array<i32>} : memref<8x1xf32, #tpu.memory_space<vmem>>, vector<8x1xf32>,
    %c0_47 = arith.constant 0 : index
    %c0_48 = arith.constant 0 : index
    %84 = vector.load %arg9[%c0_47, %c0_48] : memref<8x1xf32, #tpu.memory_space<vmem>>, vector<8x1xf32>
    %85 = arith.mulf %20, %84 : vector<8x1xf32>
    %86 = arith.addf %85, %30 : vector<8x1xf32>
    %c0_49 = arith.constant 0 : index
    %c0_50 = arith.constant 0 : index
    %87 = vector.load %arg9[%c0_49, %c0_50] : memref<8x1xf32, #tpu.memory_space<vmem>>, vector<8x1xf32>
    tpu.vector_store %arg9[%c0_49, %c0_50], %86 {strides = array<i32>} : memref<8x1xf32, #tpu.memory_space<vmem>>, vector<8x1xf32>,
    %c0_51 = arith.constant 0 : index
    %c0_52 = arith.constant 0 : index
    %88 = vector.load %arg6[%c0_51, %c0_52] : memref<8x1xf32, #tpu.memory_space<vmem>>, vector<8x1xf32>
    tpu.vector_store %arg6[%c0_51, %c0_52], %9 {strides = array<i32>} : memref<8x1xf32, #tpu.memory_space<vmem>>, vector<8x1xf32>,
    %c0_53 = arith.constant 0 : index
    %c0_54 = arith.constant 0 : index
    %89 = vector.load %arg7[%c0_53, %c0_54] : memref<8x1xf32, #tpu.memory_space<vmem>>, vector<8x1xf32>
    tpu.vector_store %arg7[%c0_53, %c0_54], %12 {strides = array<i32>} : memref<8x1xf32, #tpu.memory_space<vmem>>, vector<8x1xf32>,
    %c0_i32_55 = arith.constant 0 : i32
    %90 = arith.cmpi eq, %arg1, %c0_i32_55 : i32
    %91 = arith.extui %90 : i1 to i32
    %c0_i32_56 = arith.constant 0 : i32
    %92 = arith.cmpi ne, %91, %c0_i32_56 : i32
    scf.if %92 {
      %c0_57 = arith.constant 0 : index
      %c0_58 = arith.constant 0 : index
      %93 = vector.load %arg8[%c0_57, %c0_58] : memref<8x1xf32, #tpu.memory_space<vmem>>, vector<8x1xf32>
      %c0_59 = arith.constant 0 : index
      %c0_60 = arith.constant 0 : index
      %94 = vector.load %arg9[%c0_59, %c0_60] : memref<8x1xf32, #tpu.memory_space<vmem>>, vector<8x1xf32>
      %95 = math.log %93 : vector<8x1xf32>
      %96 = math.log %94 : vector<8x1xf32>
      %c0_61 = arith.constant 0 : index
      %c0_62 = arith.constant 0 : index
      %97 = vector.load %arg10[%c0_61, %c0_62] : memref<8x1xf32, #tpu.memory_space<vmem>>, vector<8x1xf32>
      %c0_63 = arith.constant 0 : index
      %c0_64 = arith.constant 0 : index
      %98 = vector.load %arg11[%c0_63, %c0_64] : memref<8x1xf32, #tpu.memory_space<vmem>>, vector<8x1xf32>
      %99 = arith.mulf %95, %98 : vector<8x1xf32>
      %100 = arith.subf %97, %99 : vector<8x1xf32>
      %101 = arith.divf %100, %94 : vector<8x1xf32>
      %c0_65 = arith.constant 0 : index
      %c0_66 = arith.constant 0 : index
      %102 = vector.load %arg12[%c0_65, %c0_66] : memref<8x1xf32, #tpu.memory_space<vmem>>, vector<8x1xf32>
      %103 = arith.subf %95, %96 : vector<8x1xf32>
      %c0_67 = arith.constant 0 : index
      %c0_68 = arith.constant 0 : index
      %104 = vector.load %arg13[%c0_67, %c0_68] : memref<8x1xf32, #tpu.memory_space<vmem>>, vector<8x1xf32>
      %105 = arith.mulf %103, %104 : vector<8x1xf32>
      %106 = arith.addf %102, %105 : vector<8x1xf32>
      %107 = arith.divf %106, %93 : vector<8x1xf32>
      %c0_69 = arith.constant 0 : index
      %c0_70 = arith.constant 0 : index
      %108 = vector.load %arg4[%c0_69, %c0_70] : memref<8x1xi32, #tpu.memory_space<vmem>>, vector<8x1xi32>
      %c-100_i32 = arith.constant -100 : i32
      %109 = vector.broadcast %c-100_i32 : i32 to vector<8x1xi32>
      %110 = arith.cmpi ne, %108, %109 : vector<8x1xi32>
      %111 = arith.extui %110 : vector<8x1xi1> to vector<8x1xi32>
      %112 = arith.sitofp %111 : vector<8x1xi32> to vector<8x1xf32>
      %cst_71 = arith.constant 0.000000e+00 : f32
      %113 = vector.broadcast %cst_71 : f32 to vector<8x1xf32>
      %114 = arith.select %110, %101, %113 : vector<8x1xi1>, vector<8x1xf32>
      %cst_72 = arith.constant dense<0.000000e+00> : vector<1xf32>
      %115 = vector.multi_reduction <add>, %114, %cst_72 [0] : vector<8x1xf32> to vector<1xf32>
      %116 = vector.shape_cast %115 : vector<1xf32> to vector<1x1xf32>
      %cst_73 = arith.constant 0.000000e+00 : f32
      %117 = vector.broadcast %cst_73 : f32 to vector<8x1xf32>
      %118 = arith.select %110, %107, %117 : vector<8x1xi1>, vector<8x1xf32>
      %cst_74 = arith.constant dense<0.000000e+00> : vector<1xf32>
      %119 = vector.multi_reduction <add>, %118, %cst_74 [0] : vector<8x1xf32> to vector<1xf32>
      %120 = vector.shape_cast %119 : vector<1xf32> to vector<1x1xf32>
      %cst_75 = arith.constant dense<0.000000e+00> : vector<1xf32>
      %121 = vector.multi_reduction <add>, %112, %cst_75 [0] : vector<8x1xf32> to vector<1xf32>
      %122 = vector.shape_cast %121 : vector<1xf32> to vector<1x1xf32>
      %123 = tpu.iota {dimensions = array<i32: 1>} : vector<8x128xi32>
      %124 = tpu.iota {dimensions = array<i32: 0>} : vector<8x128xi32>
      %c0_i32_76 = arith.constant 0 : i32
      %125 = vector.broadcast %c0_i32_76 : i32 to vector<8x128xi32>
      %126 = arith.cmpi eq, %124, %125 : vector<8x128xi32>
      %c0_i32_77 = arith.constant 0 : i32
      %127 = vector.broadcast %c0_i32_77 : i32 to vector<8x128xi32>
      %128 = arith.cmpi eq, %123, %127 : vector<8x128xi32>
      %129 = arith.andi %126, %128 : vector<8x128xi1>
      %c1_i32 = arith.constant 1 : i32
      %130 = vector.broadcast %c1_i32 : i32 to vector<8x128xi32>
      %131 = arith.cmpi eq, %123, %130 : vector<8x128xi32>
      %132 = arith.andi %126, %131 : vector<8x128xi1>
      %c2_i32 = arith.constant 2 : i32
      %133 = vector.broadcast %c2_i32 : i32 to vector<8x128xi32>
      %134 = arith.cmpi eq, %123, %133 : vector<8x128xi32>
      %135 = arith.andi %126, %134 : vector<8x128xi1>
      %cst_78 = arith.constant 0.000000e+00 : f32
      %136 = vector.shape_cast %122 : vector<1x1xf32> to vector<1x1xf32>
      %137 = vector.broadcast %136 : vector<1x1xf32> to vector<8x128xf32>
      %138 = vector.broadcast %cst_78 : f32 to vector<8x128xf32>
      %139 = arith.select %135, %137, %138 : vector<8x128xi1>, vector<8x128xf32>
      %140 = vector.shape_cast %120 : vector<1x1xf32> to vector<1x1xf32>
      %141 = vector.broadcast %140 : vector<1x1xf32> to vector<8x128xf32>
      %142 = arith.select %132, %141, %139 : vector<8x128xi1>, vector<8x128xf32>
      %143 = vector.shape_cast %116 : vector<1x1xf32> to vector<1x1xf32>
      %144 = vector.broadcast %143 : vector<1x1xf32> to vector<8x128xf32>
      %145 = arith.select %129, %144, %142 : vector<8x128xi1>, vector<8x128xf32>
      %c0_79 = arith.constant 0 : index
      %c0_80 = arith.constant 0 : index
      %146 = vector.load %arg5[%c0_79, %c0_80] : memref<8x128xf32, #tpu.memory_space<vmem>>, vector<8x128xf32>
      tpu.vector_store %arg5[%c0_79, %c0_80], %145 {strides = array<i32>} : memref<8x128xf32, #tpu.memory_space<vmem>>, vector<8x128xf32>,
    } else {
    }
    return
  }
  func.func @transform_0(%arg0: i32, %arg1: i32) -> (i32, i32) {
    %c0_i32 = arith.constant 0 : i32
    return %arg0, %arg1 : i32, i32
  }
  func.func @transform_1(%arg0: i32, %arg1: i32) -> (i32, i32) {
    %c0_i32 = arith.constant 0 : i32
    return %arg0, %arg1 : i32, i32
  }
  func.func @transform_2(%arg0: i32, %arg1: i32) -> (i32, i32) {
    %c0_i32 = arith.constant 0 : i32
    %c0_i32_0 = arith.constant 0 : i32
    return %arg0, %c0_i32 : i32, i32
  }
  func.func @transform_3(%arg0: i32, %arg1: i32) -> (i32, i32) {
    %c0_i32 = arith.constant 0 : i32
    %c0_i32_0 = arith.constant 0 : i32
    return %arg0, %c0_i32 : i32, i32
  }
}

</mosaic_0001>

<bundles_post_ra>
// kernel: tpu_custom_call.1
= control target key start
LH: loop header
LB: loop body
LE: loop exit
PB: predicated region body
PF: predicated region fallthrough
CT: control target
= control target key end

     0   :  { %8 = vsyncpa [#allocation11], 0  ;;  %s1028_s0 = inlined_call_operand.vmem [shape: f32[16,128], index: 0, kind: input, shape index: {}]   ;;  %s1029_s1 = inlined_call_operand.hbm [shape: f32[16,128], index: 1, kind: input, shape index: {}]   ;;  %s1030_s2 = inlined_call_operand.vmem [shape: s32[16,1], index: 2, kind: input, shape index: {}]   ;;  %s1031_s3 = inlined_call_operand.hbm [shape: f32[16,128], index: 3, kind: output, shape index: {}]  }
   0x1   :  { %10 = vsyncpa [#allocation11 + $0x1], 0 }
   0x2   :  { %11 = vsyncpa [#allocation12], 0 }
   0x3   :  { %13 = vsyncpa [#allocation12 + $0x1], 0  ;;  %s788_s12 = smov 0   ;;  %s790_s13 = smov 0  }
   0x4   :  { %s792_s14 = smov 0   ;;  %s794_s15 = smov 0  }
   0x5   :  { %s796_s16 = smov 0   ;;  %s798_s17 = smov 0  }
   0x6 LB: > { %s550_s18 = sadd.s32 4294967295, %s761_s17   ;;  %s551_s19 = sadd.s32 4294967294, %s761_s17   ;;  %s761_s17 = sphi %s798_s17, %s19_s17   ;;  %s757_s16 = sphi %s796_s16, %s1049_s16   ;;  %s753_s15 = sphi %s794_s15, %s1048_s15   ;;  %s749_s14 = sphi %s792_s14, %s1047_s14   ;;  %s745_s13 = sphi %s790_s13, %s1046_s13   ;;  %s741_s12 = sphi %s788_s12, %s1045_s12  }
   0x7   : > { %s31_s20 = sadd.s32 1, %s757_s16  ;;  %s68_s21 = sadd.s32 1, %s749_s14 }
   0x8   : > { %p33_p0 = scmp.ge.s32.totalorder %s31_s20, 2  ;;  %p75_p1 = scmp.ne.s32.totalorder %s749_s14, %s745_s13 }
   0x9   : > { %p76_p2 = scmp.eq.s32.totalorder %s761_s17, 0  ;;  %p81_p3 = scmp.ne.s32.totalorder %s745_s13, %s741_s12 }
   0xa   : > { %s1051_s20 = smov (%p33_p0, %s31_s20), 0  ;;  %p82_p5 = scmp.eq.s32.totalorder %s550_s18, 0 }
   0xb   : > { %p829_p4 = por %p76_p2, %p75_p1  ;;  %s63_s23 = ssub.s32 %s757_s16, %s1051_s20 }
   0xc   : > { %p131_p6 = scmp.eq.s32.totalorder %s550_s18, 1  ;;  %p66_p7 = scmp.eq.s32.totalorder %s63_s23, 0 }
   0xd   : > { %p835_p8 = por %p82_p5, %p81_p3  ;;  %p137_p10 = scmp.eq.s32.totalorder %s551_s19, 1 }
   0xe   : > { %p839_p9 = por %p131_p6, %p75_p1  ;;  %p578_p13 = scmp.lt.s32.totalorder %s761_s17, 2 }
   0xf   : > { %s844_s26 = scalar_select %p66_p7, %s749_s14, %s68_s21  }
  0x10   : > { %s1035_s25 = scalar_select %p839_p9, 1, 0 }
  0x11   : > { %p846_p11 = por %p137_p10, %p81_p3  ;;  %s167_s28 = sand.u32 1, %s749_s14  }
  0x12   : > { %s554_s29 = sshll.u32 %s167_s28, 3  ;;  %s555_s30 = sshll.u32 %s757_s16, 7 }
  0x13   : > { %s1036_s27 = scalar_select %p846_p11, 1, 0 }
  0x14   : > { %s857_s6 = scalar_lea.hbm %s1029_s1, %s555_s30  ;;  %s171_s7 = scalar_lea.vmem [#allocation10], %s554_s29 }
  0x15   : > { %s179_s8 = sshll.u32 %s171_s7, 4  ;;  %p863_p0 = pnand %p578_p13, %p829_p4  ;;  %s859_s8 = int_to_ptr.vmem [resolvable:$true] %s179_s8 }
  0x16   : > { %s168_s10 = scalar_lea.sflag [#allocation11], %s167_s28  ;;  %s649_s11 = scalar_lea.hbm %s857_s6, 128 }
  0x17   : > { %p650_p3 = scmp.ne.s32.totalorder %s857_s6, %s649_s11  ;;  %p651_p5 = pneg %p863_p0 }
  0x18   : > { %s654_s21 = scalar_lea.hbm %s1029_s1, 256  ;;  %p655_p4 = scmp.lt.u32.totalorder %s857_s6, %s1029_s1 }
  0x19   : > { %p652_p6 = pnand %p651_p5, %p650_p3  ;;  %p656_p10 = scmp.lt.u32.totalorder %s654_s21, %s649_s11 }
  0x1a   : > { %p658_p12 = scmp.lt.u32.totalorder %s649_s11, %s857_s6 }
  0x1b   : > { %p653_p7 = pneg %p652_p6  ;;  %p657_p13 = por %p656_p10, %p655_p4 }
  0x1d   : > { %p659_p1 = por %p658_p12, %p657_p13 }
  0x1f   : > { %p660_p2 = pnand %p659_p1, %p653_p7 }
  0x21   : > { %663 = shalt.err (!%p660_p2)
}
  0x22   : > { %s664_s28 = scalar_lea.vmem %s859_s8, 128  ;;  %s763_s29 = smov [#allocation10]  }
  0x23   : > { %p665_p3 = scmp.ne.s32.totalorder %s859_s8, %s664_s28  ;;  %s669_s30 = sshll.u32 %s763_s29, 4  ;;  %s670_s30 = int_to_ptr.vmem [resolvable:$false] %s669_s30 }
  0x24   : > { %s671_s4 = scalar_lea.vmem %s670_s30, 256  ;;  %p672_p9 = scmp.lt.s32.totalorder %s859_s8, %s670_s30 }
  0x25   : > { %p667_p6 = pnand %p665_p3, %p651_p5  ;;  %p673_p4 = scmp.lt.s32.totalorder %s671_s4, %s664_s28 }
  0x27   : > { %p668_p11 = pneg %p667_p6  ;;  %p674_p10 = por %p673_p4, %p672_p9 }
  0x29   : > { %p675_p12 = pnand %p674_p10, %p668_p11 }
  0x2b   : > { %678 = shalt.err (!%p675_p12)
}
  0x2c   : > { %573 = dma.hbm_to_vmem [thread:$0]  (!%p863_p0), %s857_s6, 128, %s859_s8, %s168_s10  }
  0x2d   : > { %p1038_p1 = scmp.lt.s32.totalorder %s761_s17, 3  ;;  %p1039_p2 = scmp.ge.s32.totalorder %s761_s17, 1 }
  0x2f   : > { %p192_p5 = pnand %p1039_p2, %p1038_p1 }
  0x30   : > { %s899_s5 = sand.u32 (!%p192_p5), 1, %s745_s13  }
  0x31   : > { %195 = sbr.rel (%p192_p5) target bundleno = 689 (0x2b1), region = 32  ;;  %s557_s7 = sshll.u32 (!%p192_p5), %s899_s5, 3 }
  0x32   : > { %s198_s11 = scalar_lea.sflag (!%p192_p5), [#allocation11], %s899_s5  ;;  %s201_s9 = scalar_lea.vmem (!%p192_p5), [#allocation10], %s557_s7 }
  0x38   : > { %732 = dma.done.wait (%p835_p8), %s198_s11, 128  }
  0x39   : > { %734 = vsyncadd (%p835_p8), %s198_s11, 4294967168  ;;  %p235_p9 = scmp.lt.s32.totalorder %s753_s15, 1  ;;  %vm252_vm0 = vcmask 7168   ;;  %v764_v0 = vmov 0.0   ;;  %v765_v1 = vmov -1e+30  }
  0x3a   : > { %258 = vst.msk [vmem:[#allocation7] sm:$0xff] %vm252_vm0, %v764_v0  ;;  %260 = vst.msk [vmem:[#allocation9] sm:$0xff] %vm252_vm0, %v764_v0  ;;  %v247_v3 = vld [vmem:[%s201_s9] sm:$0xff]  ;;  %v766_v4 = vmov 0   ;;  %s563_s23 = sshll.u32 %s753_s15, 7  ;;  %s234_s28 = scalar_lea.vmem [#allocation13], %s557_s7 }
  0x3b   : > { %255 = vst.msk [vmem:[#allocation4] sm:$0xff] %vm252_vm0, %v764_v0  ;;  %256 = vst.msk [vmem:[#allocation5] sm:$0xff] %vm252_vm0, %v764_v0  ;;  %s925_s24 = scalar_select %p235_p9, %s753_s15, 1  ;;  %631 = vset.pattern.permute.xlu1 %v766_v4  ;;  %632 = vset.pattern.permute.xlu0 %v766_v4  ;;  %v299_v37 = vand.u32 2147483647, %v247_v3 }
  0x3c   : > { %257 = vst.msk [vmem:[#allocation6] sm:$0xff] %vm252_vm0, %v764_v0  ;;  %259 = vst.msk [vmem:[#allocation8] sm:$0xff] %vm252_vm0, %v764_v0  ;;  %s444_s29 = sshll.u32 %s234_s28, 4  ;;  %s979_s11 = scalar_lea.hbm %s1031_s3, %s563_s23  ;;  %s981_s29 = int_to_ptr.vmem [resolvable:$true] %s444_s29 }
  0x3d   : > { %253 = vst.msk [vmem:[#allocation2] sm:$0xff] %vm252_vm0, %v765_v1  ;;  %254 = vst.msk [vmem:[#allocation3] sm:$0xff] %vm252_vm0, %v765_v1  ;;  %s559_s6 = sshll.u32 %s925_s24, 3  ;;  %vm300_vm2 = vcmp.eq.f32.partialorder %v299_v37, inf  ;;  %s431_s9 = scalar_lea.sflag [#allocation12], %s899_s5 }
  0x3e   : > { %s241_s18 = scalar_lea.vmem %s1028_s0, %s559_s6  ;;  %s245_s22 = scalar_lea.vmem %s1030_s2, %s559_s6 }
  0x3f   : > { %v246_v2 = vld [vmem:[%s241_s18] sm:$0xff]  ;;  %s679_s15 = scalar_lea.vmem %s981_s29, 128  ;;  %p1042_p11 = scmp.ne.s32.totalorder %s1035_s25, 0 }
  0x40   : > { %263 = vmax.xlane.f32.xlu0 %v246_v2  ;;  %v297_v36 = vand.u32 2147483647, %v246_v2  ;;  %v373_v48 = vld [vmem:[%s245_s22] sm:$0xff]  ;;  %p680_p8 = scmp.ne.s32.totalorder %s981_s29, %s679_s15  ;;  %s767_s7 = smov [#allocation13]  }
  0x41   : > { %v337_v18 = vld [vmem:[#allocation9] sm:$0xff]  ;;  %v935_v20 = vld [vmem:[#allocation7] sm:$0xff]  ;;  %vm374_vm4 = vcmp.ne.s32.totalorder %v373_v48, 4294967196  ;;  %s683_s24 = sshll.u32 %s767_s7, 4  ;;  %s684_s24 = int_to_ptr.vmem [resolvable:$false] %s683_s24 }
  0x42   : > { %vm942_vm1 = vcmp.eq.f32.partialorder %v297_v36, inf  ;;  %v561_v49 = vsel %vm374_vm4, 1.0, %v764_v0  ;;  %v341_v57 = vld [vmem:[#allocation4] sm:$0xff]  ;;  %v345_v60 = vld [vmem:[#allocation5] sm:$0xff]  ;;  %p681_p0 = pnand %p680_p8, %p1042_p11  ;;  %s685_s6 = scalar_lea.vmem %s684_s24, 256 }
  0x43   : > { %v329_v21 = vld [vmem:[#allocation8] sm:$0xff]  ;;  %v317_v25 = vld [vmem:[#allocation6] sm:$0xff]  ;;  %vm301_vm3 = vmor %vm942_vm1, %vm300_vm2  ;;  %v393_v50 = vsel %vm252_vm0, %v561_v49, 0.0  ;;  %p686_p13 = scmp.lt.s32.totalorder %s981_s29, %s684_s24  ;;  %p687_p3 = scmp.lt.s32.totalorder %s685_s6, %s679_s15 }
  0x44   : > { %266 = vmax.xlane.f32.xlu0 %v247_v3  ;;  %v261_v5 = vld [vmem:[#allocation2] sm:$0xff]  ;;  %v262_v8 = vld [vmem:[#allocation3] sm:$0xff]  ;;  %v394_v51 = vrot.slane %v393_v50, 4  ;;  %p682_p7 = pneg %p681_p0 }
  0x45   : > { %p688_p6 = por %p687_p3, %p686_p13 }
  0x46   : > { %v395_v52 = vadd.f32 %v394_v51, %v393_v50 }
  0x47   : > { %p689_p4 = pnand %p688_p6, %p682_p7 }
  0x48   : > { %v396_v53 = vrot.slane %v395_v52, 2 }
  0x4a   : > { %v397_v54 = vadd.f32 %v396_v53, %v395_v52 }
  0x4c   : > { %v398_v55 = vrot.slane %v397_v54, 1 }
  0x4e   : > { %v399_v56 = vadd.f32 %v398_v55, %v397_v54 }
  0xcd   : > { %v264_v6 = vpop.xlane.xlu0 %263 }
  0xce   : > { %v265_v7 = vmax.f32 %v261_v5, %v264_v6 }
  0xd0   : > { %v269_v9 = vsub.f32 %v261_v5, %v265_v7  ;;  %349 = vst.msk [vmem:[#allocation2] sm:$0xff] %vm252_vm0, %v265_v7  ;;  %279 = vperm.xlu1 %631, %v265_v7  }
  0xd1   : > { %v267_v10 = vpop.xlane.xlu0 %266 }
  0xd2   : > { %v270_v11 = vmax.f32 %v269_v9, -100.0  ;;  %v268_v12 = vmax.f32 %v262_v8, %v267_v10 }
  0xd4   : > { %v273_v13 = vmul.f32 1.442695, %v270_v11  ;;  %v271_v14 = vsub.f32 %v262_v8, %v268_v12  ;;  %350 = vst.msk [vmem:[#allocation3] sm:$0xff] %vm252_vm0, %v268_v12  ;;  %285 = vperm.xlu1 %631, %v268_v12   ;;  %v319_v23 = vmul.f32 %v935_v20, %v270_v11 }
  0xd6   : > { %633 = vpow2.f32 %v273_v13  ;;  %v272_v15 = vmax.f32 %v271_v14, -100.0  ;;  %v320_v27 = vadd.f32 %v319_v23, %v317_v25 }
  0xd8   : > { %v275_v16 = vmul.f32 1.442695, %v272_v15  ;;  %v330_v17 = vsub.f32 %v272_v15, %v270_v11 }
  0xda   : > { %635 = vpow2.f32 %v275_v16  ;;  %v332_v19 = vmul.f32 %v337_v18, %v330_v17 }
  0xdc   : > { %v333_v22 = vadd.f32 %v332_v19, %v329_v21 }
  0xe0   : > { %v634_v24 = vpop.eup %633 }
  0xe1   : > { %v938_v26 = vmul.f32 %v634_v24, %v333_v22  ;;  %v342_v58 = vmul.f32 %v634_v24, %v341_v57  ;;  %v338_v63 = vmul.f32 %v634_v24, %v337_v18 }
  0xe4   : > { %v636_v28 = vpop.eup %635 }
  0xe5   : > { %v940_v29 = vmul.f32 %v636_v28, %v320_v27  ;;  %v346_v62 = vmul.f32 %v636_v28, %v345_v60  ;;  %v326_v4 = vmul.f32 %v636_v28, %v935_v20 }
 0x14f   : > { %v280_v30 = vpop.permute.xlu1 %279 }
 0x150   : > { %v282_v31 = vsub.f32 %v246_v2, %v280_v30 }
 0x152   : > { %v289_v32 = vmul.f32 1.442695, %v282_v31 }
 0x153   : > { %v286_v33 = vpop.permute.xlu1 %285 }
 0x154   : > { %637 = vpow2.f32 %v289_v32  ;;  %v288_v34 = vsub.f32 %v247_v3, %v286_v33 }
 0x156   : > { %v291_v35 = vmul.f32 1.442695, %v288_v34  ;;  %v309_v42 = vsub.f32 %v288_v34, %v282_v31 }
 0x158   : > { %639 = vpow2.f32 %v291_v35 }
 0x15e   : > { %v638_v39 = vpop.eup %637 }
 0x15f   : > { %293 = vadd.xlane.f32.xlu0 %v638_v39  ;;  %v314_v41 = vsel %vm301_vm3, 0.0, %v638_v39  ;;  %v310_v44 = vmul.f32 %v638_v39, %v309_v42 }
 0x161   : > { %v311_v45 = vsel %vm301_vm3, 0.0, %v310_v44 }
 0x162   : > { %v640_v40 = vpop.eup %639 }
 0x163   : > { %295 = vadd.xlane.f32.xlu1 %v640_v40  ;;  %315 = vadd.xlane.f32.xlu0 %v314_v41  ;;  %v306_v43 = vsel %vm942_vm1, 0.0, %v640_v40  ;;  %v302_v46 = vmul.f32 %v640_v40, %v282_v31 }
 0x165   : > { %v303_v47 = vsel %vm942_vm1, 0.0, %v302_v46  ;;  %v400_v46 = vlaneseq }
 0x167   : > { %307 = vadd.xlane.f32.xlu0 %v306_v43  ;;  %v403_v48 = vshrl.u32 %v400_v46, 7 }
 0x169   : > { %vm404_vm5 = vcmp.eq.s32.totalorder %v403_v48, 0 }
 0x16b   : > { %312 = vadd.xlane.f32.xlu0 %v311_v45 }
 0x16f   : > { %304 = vadd.xlane.f32.xlu0 %v303_v47  ;;  %v401_v47 = vand.u32 127, %v400_v46 }
 0x171   : > { %vm409_vm6 = vcmp.eq.s32.totalorder %v401_v47, 2  ;;  %vm407_vm8 = vcmp.eq.s32.totalorder %v401_v47, 1  ;;  %vm405_vm9 = vcmp.eq.s32.totalorder %v401_v47, 0 }
 0x172   : > { %vm410_vm7 = vmand %vm404_vm5, %vm409_vm6 }
 0x173   : > { %vm408_vm10 = vmand %vm404_vm5, %vm407_vm8 }
 0x174   : > { %vm406_vm11 = vmand %vm404_vm5, %vm405_vm9 }
 0x185   : > { %413 = vperm.xlu0 %632, %v399_v56  }
 0x1ec   : > { %v294_v59 = vpop.xlane.xlu0 %293 }
 0x1ed   : > { %v343_v61 = vadd.f32 %v342_v58, %v294_v59 }
 0x1ef   : > { %344 = vst.msk [vmem:[#allocation4] sm:$0xff] %vm252_vm0, %v343_v61 }
 0x1f0   : > { %v296_v1 = vpop.xlane.xlu1 %295  ;;  %v316_v0 = vpop.xlane.xlu0 %315 }
 0x1f1   : > { %v347_v2 = vadd.f32 %v346_v62, %v296_v1  ;;  %v339_v3 = vadd.f32 %v338_v63, %v316_v0 }
 0x1f3   : > { %348 = vst.msk [vmem:[#allocation5] sm:$0xff] %vm252_vm0, %v347_v2  ;;  %340 = vst.msk [vmem:[#allocation9] sm:$0xff] %vm252_vm0, %v339_v3 }
 0x1f4   : > { %v308_v5 = vpop.xlane.xlu0 %307 }
 0x1f5   : > { %v327_v6 = vadd.f32 %v326_v4, %v308_v5 }
 0x1f6   : > { %v354_v7 = vld [vmem:[#allocation4] sm:$0xff] }
 0x1f7   : > { %328 = vst.msk [vmem:[#allocation7] sm:$0xff] %vm252_vm0, %v327_v6  ;;  %641 = vlog2.f32 %v354_v7 }
 0x1f8   : > { %v313_v8 = vpop.xlane.xlu0 %312 }
 0x1f9   : > { %v335_v9 = vadd.f32 %v938_v26, %v313_v8 }
 0x1fa   : > { %v355_v10 = vld [vmem:[#allocation5] sm:$0xff] }
 0x1fb   : > { %336 = vst.msk [vmem:[#allocation8] sm:$0xff] %vm252_vm0, %v335_v9  ;;  %643 = vlog2.f32 %v355_v10  ;;  %v368_v23 = vld [vmem:[#allocation9] sm:$0xff] }
 0x1fc   : > { %v305_v11 = vpop.xlane.xlu0 %304  ;;  %645 = vrcp.f32 %v355_v10 }
 0x1fd   : > { %v322_v12 = vadd.f32 %v940_v29, %v305_v11  ;;  %647 = vrcp.f32 %v354_v7 }
 0x1fe   : > { %v361_v15 = vld [vmem:[#allocation7] sm:$0xff] }
 0x1ff   : > { %324 = vst.msk [vmem:[#allocation6] sm:$0xff] %vm252_vm0, %v322_v12 }
 0x201   : > { %v642_v13 = vpop.eup %641 }
 0x202   : > { %v357_v14 = vmul.f32 0.6931472, %v642_v13  ;;  %v366_v26 = vld [vmem:[#allocation8] sm:$0xff] }
 0x204   : > { %v362_v16 = vmul.f32 %v361_v15, %v357_v14  ;;  %v414_v49 = vpop.permute.xlu0 %413 }
 0x205   : > { %v644_v17 = vpop.eup %643  ;;  %v416_v51 = vsel %vm410_vm7, %v414_v49, 0.0 }
 0x206   : > { %v359_v18 = vmul.f32 0.6931472, %v644_v17  ;;  %v360_v19 = vld [vmem:[#allocation6] sm:$0xff]  ;;  %v646_v21 = vpop.eup %645 }
 0x207   : > { %v363_v20 = vsub.f32 %v360_v19, %v362_v16  ;;  %v648_v30 = vpop.eup %647 }
 0x208   : > { %v367_v22 = vsub.f32 %v357_v14, %v359_v18 }
 0x209   : > { %v365_v24 = vmul.f32 %v646_v21, %v363_v20 }
 0x20a   : > { %v369_v25 = vmul.f32 %v368_v23, %v367_v22 }
 0x20b   : > { %v377_v27 = vsel %vm374_vm4, %v365_v24, 0.0 }
 0x20c   : > { %v370_v28 = vadd.f32 %v369_v25, %v366_v26  ;;  %v378_v29 = vsel %vm252_vm0, %v377_v27, 0.0 }
 0x20d   : > { %v379_v31 = vrot.slane %v378_v29, 4 }
 0x20e   : > { %v372_v32 = vmul.f32 %v648_v30, %v370_v28 }
 0x20f   : > { %v380_v34 = vadd.f32 %v379_v31, %v378_v29 }
 0x210   : > { %v385_v33 = vsel %vm374_vm4, %v372_v32, 0.0 }
 0x211   : > { %v386_v35 = vsel %vm252_vm0, %v385_v33, 0.0  ;;  %v381_v38 = vrot.slane %v380_v34, 2 }
 0x212   : > { %v387_v36 = vrot.slane %v386_v35, 4 }
 0x213   : > { %v382_v41 = vadd.f32 %v381_v38, %v380_v34 }
 0x214   : > { %v388_v37 = vadd.f32 %v387_v36, %v386_v35 }
 0x215   : > { %v383_v44 = vrot.slane %v382_v41, 1 }
 0x216   : > { %v389_v39 = vrot.slane %v388_v37, 2 }
 0x217   : > { %v384_v45 = vadd.f32 %v383_v44, %v382_v41 }
 0x218   : > { %v390_v40 = vadd.f32 %v389_v39, %v388_v37 }
 0x21a   : > { %v391_v42 = vrot.slane %v390_v40, 1 }
 0x21c   : > { %v392_v43 = vadd.f32 %v391_v42, %v390_v40 }
 0x21e   : > { %419 = vperm.xlu1 %631, %v392_v43  }
 0x222   : > { %425 = vperm.xlu1 %631, %v384_v45  }
 0x29d   : > { %v420_v50 = vpop.permute.xlu1 %419 }
 0x29e   : > { %v422_v52 = vsel %vm408_vm10, %v420_v50, %v416_v51 }
 0x2a1   : > { %v426_v53 = vpop.permute.xlu1 %425 }
 0x2a2   : > { %v428_v54 = vsel %vm406_vm11, %v426_v53, %v422_v52 }
 0x2a3   : > { %429 = vst [vmem:[%s234_s28] sm:$0xff] %v428_v54 }
 0x2a4   : > { %692 = shalt.err (!%p689_p4)
}
 0x2a5   : > { %s693_s5 = scalar_lea.hbm %s979_s11, 128  ;;  %s697_s18 = scalar_lea.hbm %s1031_s3, 256 }
 0x2a6   : > { %p694_p10 = scmp.ne.s32.totalorder %s979_s11, %s693_s5  ;;  %p698_p2 = scmp.lt.u32.totalorder %s979_s11, %s1031_s3 }
 0x2a7   : > { %p699_p5 = scmp.lt.u32.totalorder %s697_s18, %s693_s5  ;;  %p701_p8 = scmp.lt.u32.totalorder %s693_s5, %s979_s11 }
 0x2a8   : > { %p695_p12 = pnand %p694_p10, %p1042_p11 }
 0x2a9   : > { %p700_p9 = por %p699_p5, %p698_p2 }
 0x2aa   : > { %p696_p1 = pneg %p695_p12 }
 0x2ab   : > { %p702_p0 = por %p701_p8, %p700_p9 }
 0x2ad   : > { %p703_p7 = pnand %p702_p0, %p696_p1 }
 0x2af   : > { %706 = shalt.err (!%p703_p7)
}
 0x2b0   : > { %568 = dma.vmem_to_hbm [thread:$0]  (%p1042_p11), %s981_s29, 128, %s979_s11, %s431_s9  }
 0x2b1 PF: > { %s456_s22 = sand.u32 1, %s741_s12   ;;  %p1043_p13 = scmp.ne.s32.totalorder %s1036_s27, 0 }
 0x2b2   : > { %p1044_p3 = scmp.ge.s32.totalorder %s761_s17, 2  ;;  %s457_s23 = scalar_lea.sflag [#allocation12], %s456_s22 }
 0x2b4   : > { %p575_p6 = pnand %p1044_p3, %p1043_p13 }
 0x2b6   : > { %736 = dma.done.wait (!%p575_p6), %s457_s23, 128  }
 0x2b7   : > { %738 = vsyncadd (!%p575_p6), %s457_s23, 4294967168  ;;  %s19_s17 = sadd.s32 1, %s761_s17   ;;  %s1045_s12 = smov %s745_s13 }
 0x2b8   : > { %p16_p4 = scmp.ge.s32.totalorder %s19_s17, 4   ;;  %s1046_s13 = smov %s749_s14 }
 0x2b9   : > { %s1047_s14 = smov %s844_s26  ;;  %s1048_s15 = smov %s757_s16 }
 0x2ba   : > { %s1049_s16 = smov %s1051_s20  ;;  %18 = sbr.rel (!%p16_p4) target bundleno = 6 (0x6), region = 91 }
 0x2c1   :  { %462 = vsyncpa [#allocation11], 1 }
 0x2c2   :  { %464 = vsyncpa [#allocation11 + $0x1], 1 }
 0x2c3   :  { %465 = vsyncpa [#allocation12], 1 }
 0x2c4   :  { %467 = vsyncpa [#allocation12 + $0x1], 1 }

</bundles_post_ra>
